<compile_context>
chip_gen: v6e
topology: v6e:2x2x1
jax: 0.10.0
libtpu: 0.0.40
codegen_flags: <defaults>
</compile_context>

<pallas_src>
import math

import jax
import jax.numpy as jnp
from jax import lax
from jax.experimental import pallas as pl
from jax.experimental.pallas import tpu as pltpu

d_k = d_v = 64

_VMEM_TILE_BUDGET = 12 * 1024 * 1024  # double-buffered tile budget (fits v5e's 16 MiB)


def _sdpa_kernel(q_ref, k_ref, v_ref, mask_ref, ctx_ref, attn_ref):
    # Blocks per grid step:
    #   q_ref:    (G, TQ, Dk)  f32
    #   k_ref:    (G, Sk, Dk)  f32
    #   v_ref:    (G, Sk, Dv)  f32
    #   mask_ref: (G, TQ, Sk)  int8 (nonzero == masked)
    #   ctx_ref:  (G, TQ, Dv)  f32
    #   attn_ref: (G, TQ, Sk)  f32
    scale = 1.0 / math.sqrt(d_k)

    # Fold the 1/sqrt(d_k) scale into Q (cheaper: TQ*Dk muls vs TQ*Sk), then feed
    # the MXU bf16 operands with f32 accumulation.
    q = (q_ref[...] * scale).astype(jnp.bfloat16)
    k = k_ref[...].astype(jnp.bfloat16)
    v = v_ref[...].astype(jnp.bfloat16)

    # scores[g, q, k] = sum_d Q[g, q, d] * K[g, k, d]  -- contract last dims of both,
    # batch over heads; no explicit K transpose is materialized.
    scores = lax.dot_general(
        q, k,
        dimension_numbers=(((2,), (2,)), ((0,), (0,))),
        preferred_element_type=jnp.float32,
    )

    # masked_fill_(attn_mask, -1e9)
    scores = jnp.where(mask_ref[...] != 0, jnp.float32(-1e9), scores)

    # Softmax over keys (max-subtracted; identical semantics to torch softmax,
    # fully-masked rows become uniform 1/Sk exactly like masked_fill + softmax).
    smax = jnp.max(scores, axis=-1, keepdims=True)
    e = jnp.exp(scores - smax)
    denom = jnp.sum(e, axis=-1, keepdims=True)
    attn = e * pl.reciprocal(denom, approx=True)

    # context = attn @ V  (bf16 operands, f32 accumulation)
    ctx = lax.dot_general(
        attn.astype(jnp.bfloat16), v,
        dimension_numbers=(((2,), (1,)), ((0,), (0,))),
        preferred_element_type=jnp.float32,
    )

    attn_ref[...] = attn.astype(attn_ref.dtype)
    ctx_ref[...] = ctx.astype(ctx_ref.dtype)


def _choose_tiles(BH, Sq, Sk, Dk, Dv, budget_bytes=_VMEM_TILE_BUDGET):
    """Pick (G heads per step, TQ query rows per step) under a VMEM budget."""

    def footprint(G, TQ):
        # Double-buffered bytes for all per-step blocks (int8 mask + f32 rest).
        per_buf = G * (TQ * Dk * 4            # q
                       + Sk * (Dk + Dv) * 4   # k, v (full key axis resident)
                       + TQ * Sk * (1 + 4)    # int8 mask in + f32 attn out
                       + TQ * Dv * 4)         # ctx
        return 2 * per_buf

    if Sq <= 256:
        TQ = Sq  # full dim -> always a legal block
    else:
        TQ = 256
        while TQ > 32 and footprint(1, TQ) > budget_bytes:
            TQ //= 2
    # NOTE: for extremely long Sk where even (TQ=32, G=1) with resident K/V exceeds
    # the budget, an inner Sk loop with online softmax would be needed; not required
    # for the shapes this module is used with.

    # Group heads per grid step when the per-head tile is tiny (amortizes the
    # ~0.35 us per-step overhead and makes DMAs larger / more lane-dense).
    G = 1
    for cand in range(min(BH, 16), 0, -1):
        if BH % cand == 0 and footprint(cand, TQ) <= budget_bytes:
            G = cand
            break
    return G, TQ


def scaled_dot_product_attention(Q, K, V, attn_mask):
    """Q, K: [B, H, Sq, d_k]; V: [B, H, Sk, d_v]; attn_mask: [B, H, Sq, Sk] (bool).

    Returns (context [B, H, Sq, d_v], attn [B, H, Sq, Sk]) like the PyTorch module.
    """
    B, H, Sq, Dk = Q.shape
    Sk = K.shape[2]
    Dv = V.shape[3]
    BH = B * H

    q = Q.reshape(BH, Sq, Dk)
    k = K.reshape(BH, Sk, Dk)
    v = V.reshape(BH, Sk, Dv)
    # int8 mask: 4x less HBM traffic than the previous f32 mask.
    m = attn_mask.reshape(BH, Sq, Sk).astype(jnp.int8)

    G, TQ = _choose_tiles(BH, Sq, Sk, Dk, Dv)
    grid = (BH // G, pl.cdiv(Sq, TQ))

    grid_spec = pltpu.PrefetchScalarGridSpec(
        num_scalar_prefetch=0,
        grid=grid,
        in_specs=[
            pl.BlockSpec((G, TQ, Dk), lambda g, qi: (g, qi, 0)),
            # K/V block index is constant across the inner qi axis -> re-DMA skipped.
            pl.BlockSpec((G, Sk, Dk), lambda g, qi: (g, 0, 0)),
            pl.BlockSpec((G, Sk, Dv), lambda g, qi: (g, 0, 0)),
            pl.BlockSpec((G, TQ, Sk), lambda g, qi: (g, qi, 0)),
        ],
        out_specs=[
            pl.BlockSpec((G, TQ, Dv), lambda g, qi: (g, qi, 0)),
            pl.BlockSpec((G, TQ, Sk), lambda g, qi: (g, qi, 0)),
        ],
    )

    ctx, attn = pl.pallas_call(
        _sdpa_kernel,
        grid_spec=grid_spec,
        out_shape=(
            jax.ShapeDtypeStruct((BH, Sq, Dv), jnp.float32),
            jax.ShapeDtypeStruct((BH, Sq, Sk), jnp.float32),
        ),
        compiler_params=pltpu.CompilerParams(
            dimension_semantics=("parallel", "parallel"),
            vmem_limit_bytes=32 * 1024 * 1024,
        ),
    )(q, k, v, m)

    return ctx.reshape(B, H, Sq, Dv), attn.reshape(B, H, Sq, Sk)


def _reference(Q, K, V, attn_mask):
    scores = jnp.einsum("bhqd,bhkd->bhqk", Q, K) / math.sqrt(d_k)
    scores = jnp.where(attn_mask, -1e9, scores)
    attn = jax.nn.softmax(scores, axis=-1)
    ctx = jnp.einsum("bhqk,bhkd->bhqd", attn, V)
    return ctx, attn


if __name__ == "__main__":
    key = jax.random.PRNGKey(0)
    B, H, S = 2, 2, 8  # small shapes; d_k = d_v = 64 per module definition
    kq, kk, kv, km = jax.random.split(key, 4)

    Q = jax.random.normal(kq, (B, H, S, d_k), dtype=jnp.float32)
    K = jax.random.normal(kk, (B, H, S, d_k), dtype=jnp.float32)
    V = jax.random.normal(kv, (B, H, S, d_v), dtype=jnp.float32)
    # Boolean attention mask (True == masked), mask a random ~20% of positions.
    attn_mask = jax.random.uniform(km, (B, H, S, S)) < 0.2

    ctx, attn = scaled_dot_product_attention(Q, K, V, attn_mask)
    jax.block_until_ready((ctx, attn))

    ctx_ref, attn_ref = _reference(Q, K, V, attn_mask)
    assert ctx.shape == (B, H, S, d_v) and attn.shape == (B, H, S, S)
    # Tolerances loosened vs. the pure-f32 version because the matmuls use bf16
    # operands (f32 accumulation) and the softmax denominator uses the EUP
    # approximate reciprocal.
    assert jnp.allclose(attn, attn_ref, atol=2e-2, rtol=2e-2)
    assert jnp.allclose(ctx, ctx_ref, atol=5e-2, rtol=5e-2)

    print("KERNEL_OK")
</pallas_src>

<mosaic_0001>
module attributes {stable_mosaic.version = 11 : i64} {
  func.func @_sdpa_kernel(%arg0: i32, %arg1: i32, %arg2: memref<4x8x64xf32, #tpu.memory_space<vmem>>, %arg3: memref<4x8x64xf32, #tpu.memory_space<vmem>>, %arg4: memref<4x8x64xf32, #tpu.memory_space<vmem>>, %arg5: memref<4x8x8xi8, #tpu.memory_space<vmem>>, %arg6: memref<4x8x64xf32, #tpu.memory_space<vmem>>, %arg7: memref<4x8x8xf32, #tpu.memory_space<vmem>>) attributes {dimension_semantics = [#tpu.dimension_semantics<parallel>, #tpu.dimension_semantics<parallel>], iteration_bounds = array<i64: 1, 1>, scalar_prefetch = 0 : i64, scratch_operands = 0 : i64, tpu.core_type = #tpu.core_type<tc>, window_params = [{transform_indices = @transform_0, window_bounds = array<i64: 4, 8, 64>}, {transform_indices = @transform_1, window_bounds = array<i64: 4, 8, 64>}, {transform_indices = @transform_2, window_bounds = array<i64: 4, 8, 64>}, {transform_indices = @transform_3, window_bounds = array<i64: 4, 8, 8>}, {transform_indices = @transform_4, window_bounds = array<i64: 4, 8, 64>}, {transform_indices = @transform_5, window_bounds = array<i64: 4, 8, 8>}]} {
    %c0 = arith.constant 0 : index
    %c0_0 = arith.constant 0 : index
    %c0_1 = arith.constant 0 : index
    %0 = vector.load %arg2[%c0, %c0_0, %c0_1] : memref<4x8x64xf32, #tpu.memory_space<vmem>>, vector<4x8x64xf32>
    %cst = arith.constant 1.250000e-01 : f32
    %1 = vector.broadcast %cst : f32 to vector<4x8x64xf32>
    %2 = arith.mulf %0, %1 : vector<4x8x64xf32>
    %3 = arith.truncf %2 : vector<4x8x64xf32> to vector<4x8x64xbf16>
    %c0_2 = arith.constant 0 : index
    %c0_3 = arith.constant 0 : index
    %c0_4 = arith.constant 0 : index
    %4 = vector.load %arg3[%c0_2, %c0_3, %c0_4] : memref<4x8x64xf32, #tpu.memory_space<vmem>>, vector<4x8x64xf32>
    %5 = arith.truncf %4 : vector<4x8x64xf32> to vector<4x8x64xbf16>
    %c0_5 = arith.constant 0 : index
    %c0_6 = arith.constant 0 : index
    %c0_7 = arith.constant 0 : index
    %6 = vector.load %arg4[%c0_5, %c0_6, %c0_7] : memref<4x8x64xf32, #tpu.memory_space<vmem>>, vector<4x8x64xf32>
    %7 = arith.truncf %6 : vector<4x8x64xf32> to vector<4x8x64xbf16>
    %cst_8 = arith.constant dense<0.000000e+00> : vector<4x8x8xf32>
    %8 = tpu.matmul %3, %5, %cst_8 {dimension_numbers = #tpu.dot_dimension_numbers<[2], [2], [1], [1], [0, 0, 0, 1, 1, 1], [0], [0]>} : vector<4x8x64xbf16>, vector<4x8x64xbf16>, vector<4x8x8xf32> -> vector<4x8x8xf32>
    %c0_9 = arith.constant 0 : index
    %c0_10 = arith.constant 0 : index
    %c0_11 = arith.constant 0 : index
    %9 = vector.load %arg5[%c0_9, %c0_10, %c0_11] : memref<4x8x8xi8, #tpu.memory_space<vmem>>, vector<4x8x8xi8>
    %c0_i8 = arith.constant 0 : i8
    %10 = vector.broadcast %c0_i8 : i8 to vector<4x8x8xi8>
    %11 = arith.cmpi ne, %9, %10 : vector<4x8x8xi8>
    %cst_12 = arith.constant -1.000000e+09 : f32
    %12 = vector.broadcast %cst_12 : f32 to vector<4x8x8xf32>
    %13 = arith.select %11, %12, %8 : vector<4x8x8xi1>, vector<4x8x8xf32>
    %cst_13 = arith.constant dense<0xFF800000> : vector<4x8xf32>
    %14 = vector.multi_reduction <maximumf>, %13, %cst_13 [2] : vector<4x8x8xf32> to vector<4x8xf32>
    %15 = vector.shape_cast %14 : vector<4x8xf32> to vector<4x8x1xf32>
    %16 = vector.broadcast %15 : vector<4x8x1xf32> to vector<4x8x8xf32>
    %17 = arith.subf %13, %16 : vector<4x8x8xf32>
    %18 = math.exp %17 : vector<4x8x8xf32>
    %cst_14 = arith.constant dense<0.000000e+00> : vector<4x8xf32>
    %19 = vector.multi_reduction <add>, %18, %cst_14 [2] : vector<4x8x8xf32> to vector<4x8xf32>
    %20 = vector.shape_cast %19 : vector<4x8xf32> to vector<4x8x1xf32>
    %21 = tpu.reciprocal %20 {approx = true} : vector<4x8x1xf32> -> vector<4x8x1xf32>
    %22 = vector.broadcast %21 : vector<4x8x1xf32> to vector<4x8x8xf32>
    %23 = arith.mulf %18, %22 : vector<4x8x8xf32>
    %24 = arith.truncf %23 : vector<4x8x8xf32> to vector<4x8x8xbf16>
    %cst_15 = arith.constant dense<0.000000e+00> : vector<4x8x64xf32>
    %25 = tpu.matmul %24, %7, %cst_15 {dimension_numbers = #tpu.dot_dimension_numbers<[2], [1], [1], [2], [0, 0, 0, 1, 1, 2], [0], [0]>} : vector<4x8x8xbf16>, vector<4x8x64xbf16>, vector<4x8x64xf32> -> vector<4x8x64xf32>
    %c0_16 = arith.constant 0 : index
    %c0_17 = arith.constant 0 : index
    %c0_18 = arith.constant 0 : index
    %26 = vector.load %arg7[%c0_16, %c0_17, %c0_18] : memref<4x8x8xf32, #tpu.memory_space<vmem>>, vector<4x8x8xf32>
    tpu.vector_store %arg7[%c0_16, %c0_17, %c0_18], %23 {strides = array<i32>} : memref<4x8x8xf32, #tpu.memory_space<vmem>>, vector<4x8x8xf32>,
    %c0_19 = arith.constant 0 : index
    %c0_20 = arith.constant 0 : index
    %c0_21 = arith.constant 0 : index
    %27 = vector.load %arg6[%c0_19, %c0_20, %c0_21] : memref<4x8x64xf32, #tpu.memory_space<vmem>>, vector<4x8x64xf32>
    tpu.vector_store %arg6[%c0_19, %c0_20, %c0_21], %25 {strides = array<i32>} : memref<4x8x64xf32, #tpu.memory_space<vmem>>, vector<4x8x64xf32>,
    return
  }
  func.func @transform_0(%arg0: i32, %arg1: i32) -> (i32, i32, i32) {
    %c0_i32 = arith.constant 0 : i32
    %c0_i32_0 = arith.constant 0 : i32
    return %arg0, %arg1, %c0_i32 : i32, i32, i32
  }
  func.func @transform_1(%arg0: i32, %arg1: i32) -> (i32, i32, i32) {
    %c0_i32 = arith.constant 0 : i32
    %c0_i32_0 = arith.constant 0 : i32
    %c0_i32_1 = arith.constant 0 : i32
    return %arg0, %c0_i32, %c0_i32_0 : i32, i32, i32
  }
  func.func @transform_2(%arg0: i32, %arg1: i32) -> (i32, i32, i32) {
    %c0_i32 = arith.constant 0 : i32
    %c0_i32_0 = arith.constant 0 : i32
    %c0_i32_1 = arith.constant 0 : i32
    return %arg0, %c0_i32, %c0_i32_0 : i32, i32, i32
  }
  func.func @transform_3(%arg0: i32, %arg1: i32) -> (i32, i32, i32) {
    %c0_i32 = arith.constant 0 : i32
    %c0_i32_0 = arith.constant 0 : i32
    return %arg0, %arg1, %c0_i32 : i32, i32, i32
  }
  func.func @transform_4(%arg0: i32, %arg1: i32) -> (i32, i32, i32) {
    %c0_i32 = arith.constant 0 : i32
    %c0_i32_0 = arith.constant 0 : i32
    return %arg0, %arg1, %c0_i32 : i32, i32, i32
  }
  func.func @transform_5(%arg0: i32, %arg1: i32) -> (i32, i32, i32) {
    %c0_i32 = arith.constant 0 : i32
    %c0_i32_0 = arith.constant 0 : i32
    return %arg0, %arg1, %c0_i32 : i32, i32, i32
  }
}

</mosaic_0001>

<bundles_post_ra>
// kernel: tpu_custom_call.1
= control target key start
LH: loop header
LB: loop body
LE: loop exit
PB: predicated region body
PF: predicated region fallthrough
CT: control target
= control target key end

     0   :  { %11 = vsyncpa [#allocation3], 0  ;;  %s956_s0 = inlined_call_operand.hbm [shape: f32[4,8,64], index: 0, kind: input, shape index: {}]   ;;  %s957_s1 = inlined_call_operand.hbm [shape: f32[4,8,64], index: 1, kind: input, shape index: {}]   ;;  %s958_s2 = inlined_call_operand.hbm [shape: f32[4,8,64], index: 2, kind: input, shape index: {}]   ;;  %s959_s3 = inlined_call_operand.hbm [shape: s8[4,8,8], index: 3, kind: input, shape index: {}]   ;;  %s960_s4 = inlined_call_operand.hbm [shape: f32[4,8,64], index: 4, kind: output, shape index: {0}]   ;;  %s961_s5 = inlined_call_operand.hbm [shape: f32[4,8,8], index: 5, kind: output, shape index: {1}]  }
   0x1   :  { %12 = vsyncpa [#allocation6], 0 }
   0x2   :  { %13 = vsyncpa [#allocation9], 0 }
   0x3   :  { %14 = vsyncpa [#allocation4], 0 }
   0x4   :  { %15 = vsyncpa [#allocation12], 0  ;;  %s824_s18 = smov [#allocation5]   ;;  %s825_s20 = smov [#allocation2]  }
   0x5   :  { %s33_s19 = sshll.u32 %s824_s18, 4  ;;  %s21_s21 = sshll.u32 %s825_s20, 4  ;;  %s34_s19 = int_to_ptr.vmem [resolvable:$true] %s33_s19  ;;  %s22_s21 = int_to_ptr.vmem [resolvable:$true] %s21_s21 }
   0x6   :  { %s702_s22 = scalar_lea.vmem %s34_s19, 512  ;;  %p707_p1 = scmp.lt.s32.totalorder %s34_s19, %s34_s19 }
   0x7   :  { %p703_p0 = scmp.ne.s32.totalorder %s34_s19, %s702_s22  ;;  %p708_p2 = scmp.lt.s32.totalorder %s702_s22, %s702_s22 }
   0x9   :  { %p709_p3 = por %p708_p2, %p707_p1 }
   0xb   :  { %p710_p4 = pnand %p709_p3, %p703_p0 }
   0xd   :  { %713 = shalt.err (!%p710_p4)
}
   0xe   :  { %s826_s23 = smov 128   ;;  %s827_s24 = smov 8  }
   0xf   :  { %39 = dma.hbm_to_vmem [thread:$0]  %s957_s1, 512, %s34_s19, [#allocation6], %s826_s23, %s826_s23, %s827_s24  }
  0x10   :  { %s722_s27 = scalar_lea.vmem %s22_s21, 512  ;;  %p727_p6 = scmp.lt.s32.totalorder %s22_s21, %s22_s21 }
  0x11   :  { %p723_p5 = scmp.ne.s32.totalorder %s22_s21, %s722_s27  ;;  %p728_p7 = scmp.lt.s32.totalorder %s722_s27, %s722_s27 }
  0x13   :  { %p729_p8 = por %p728_p7, %p727_p6 }
  0x15   :  { %p730_p9 = pnand %p729_p8, %p723_p5 }
  0x17   :  { %733 = shalt.err (!%p730_p9)
}
  0x18   :  { %27 = dma.hbm_to_vmem [thread:$0]  %s956_s0, 512, %s22_s21, [#allocation3], %s826_s23, %s826_s23, %s827_s24  }
  0x19   :  { %s828_s30 = smov [#allocation7]   ;;  %s829_s7 = smov [#allocation8]  }
  0x1a   :  { %s45_s6 = sshll.u32 %s828_s30, 4  ;;  %s57_s8 = sshll.u32 %s829_s7, 4  ;;  %s46_s6 = int_to_ptr.vmem [resolvable:$true] %s45_s6  ;;  %s58_s8 = int_to_ptr.vmem [resolvable:$true] %s57_s8 }
  0x1b   :  { %s742_s1 = scalar_lea.vmem %s46_s6, 512  ;;  %p747_p11 = scmp.lt.s32.totalorder %s46_s6, %s46_s6 }
  0x1c   :  { %p743_p10 = scmp.ne.s32.totalorder %s46_s6, %s742_s1  ;;  %p748_p12 = scmp.lt.s32.totalorder %s742_s1, %s742_s1 }
  0x1e   :  { %p749_p13 = por %p748_p12, %p747_p11 }
  0x20   :  { %p750_p0 = pnand %p749_p13, %p743_p10 }
  0x22   :  { %753 = shalt.err (!%p750_p0)
}
  0x23   :  { %51 = dma.hbm_to_vmem [thread:$0]  %s958_s2, 512, %s46_s6, [#allocation6], %s826_s23, %s826_s23, %s827_s24  }
  0x24   :  { %s762_s0 = scalar_lea.vmem %s58_s8, 128  ;;  %p767_p2 = scmp.lt.s32.totalorder %s58_s8, %s58_s8 }
  0x25   :  { %p763_p1 = scmp.ne.s32.totalorder %s58_s8, %s762_s0  ;;  %p768_p3 = scmp.lt.s32.totalorder %s762_s0, %s762_s0 }
  0x27   :  { %p769_p4 = por %p768_p3, %p767_p2 }
  0x29   :  { %p770_p5 = pnand %p769_p4, %p763_p1 }
  0x2b   :  { %773 = shalt.err (!%p770_p5)
}
  0x2c   :  { %s830_s11 = smov 32   ;;  %s831_s12 = smov 2  }
  0x2d   :  { %63 = dma.hbm_to_vmem [thread:$0]  %s959_s3, 128, %s58_s8, [#allocation9], %s830_s11, %s830_s11, %s831_s12  }
  0x2e   :  { %814 = dma.done.wait [#allocation3], 512  }
  0x2f   :  { %815 = vsyncadd [#allocation3], 4294966784 }
  0x30   :  { %816 = dma.done.wait [#allocation6], 1024  }
  0x31   :  { %817 = vsyncadd [#allocation6], 4294966272 }
  0x32   :  { %818 = dma.done.wait [#allocation9], 128  }
  0x33   :  { %819 = vsyncadd [#allocation9], 4294967168  ;;  %v832_v0 = vmov 0.0   ;;  %vm833_vm0 = vmmov 0   ;;  %v91_v1 = vld [vmem:[#allocation5] sm:$0xff]  ;;  %vm107_vm1 = vcmask 523264  }
  0x34   :  { %617 = vmatprep.subr.bf16.mxu0 %v832_v0  ;;  %623 = vmatprep.subr.bf16.mxu1 %v832_v0  ;;  %v92_v2 = vld [vmem:[#allocation5 + $0x8] sm:$0xff]  ;;  %v79_v3 = vld [vmem:[#allocation2] sm:$0xff]  ;;  %v95_v4 = vpack.c.bf16 %v91_v1, %v91_v1  ;;  %v93_v7 = vld [vmem:[#allocation5 + $0x10] sm:$0xff]  ;;  %v834_v27 = vmov 0   ;;  %vm316_vm8 = vcmask 64512   ;;  %vm368_vm11 = vcmask 1043456  }
  0x35   :  { %619 = vmatprep.mubr.msk.bf16.mxu0 %vm833_vm0, %v832_v0  ;;  %625 = vmatprep.mubr.msk.bf16.mxu1 %vm833_vm0, %v832_v0  ;;  %v96_v5 = vpack.c.bf16 %v92_v2, %v92_v2  ;;  %v80_v6 = vld [vmem:[#allocation2 + $0x8] sm:$0xff]  ;;  %v94_v8 = vld [vmem:[#allocation5 + $0x18] sm:$0xff]  ;;  %v83_v11 = vmul.f32 0.125, %v79_v3  ;;  %v97_v13 = vpack.c.bf16 %v93_v7, %v93_v7  ;;  %v81_v17 = vld [vmem:[#allocation2 + $0x10] sm:$0xff]  ;;  %s835_s2 = smov [#allocation11]  }
  0x36   :  { %v112_v9 = vsel %vm107_vm1, %v95_v4, 0  ;;  %v84_v12 = vmul.f32 0.125, %v80_v6  ;;  %v98_v14 = vpack.c.bf16 %v94_v8, %v94_v8  ;;  %v82_v18 = vld [vmem:[#allocation2 + $0x18] sm:$0xff]  ;;  %v85_v21 = vmul.f32 0.125, %v81_v17  ;;  %v292_v25 = vld [vmem:[#allocation8] sm:$0x3] }
  0x37   :  { %v158_v10 = vsel %vm107_vm1, %v96_v5, 0  ;;  %618 = vmatpush3.bf16.xpose.msra.mxu0 %v112_v9  ;;  %v87_v15 = vpack.c.bf16 %v83_v11, %v83_v11  ;;  %v204_v19 = vsel %vm107_vm1, %v97_v13, 0  ;;  %v86_v22 = vmul.f32 0.125, %v82_v18  ;;  %v293_v26 = vld [vmem:[#allocation8 + $0x2] sm:$0x3]  ;;  %s575_s3 = sshll.u32 %s835_s2, 4  ;;  %s576_s3 = int_to_ptr.vmem [resolvable:$true] %s575_s3 }
  0x38   :  { %624 = vmatpush3.bf16.xpose.msra.mxu1 %v158_v10  ;;  %629 = vmatprep.subr.bf16.mxu0 %v832_v0  ;;  %v88_v16 = vpack.c.bf16 %v84_v12, %v84_v12  ;;  %v250_v20 = vsel %vm107_vm1, %v98_v14, 0  ;;  %v89_v23 = vpack.c.bf16 %v85_v21, %v85_v21  ;;  %vm296_vm2 = vnez %v292_v25  ;;  %v294_v30 = vld [vmem:[#allocation8 + $0x4] sm:$0x3]  ;;  %v295_v31 = vld [vmem:[#allocation8 + $0x6] sm:$0x3]  ;;  %s774_s15 = scalar_lea.vmem %s576_s3, 512  ;;  %p779_p7 = scmp.lt.s32.totalorder %s576_s3, %s576_s3 }
  0x39   :  { %635 = vmatprep.subr.bf16.mxu1 %v832_v0  ;;  %v90_v24 = vpack.c.bf16 %v86_v22, %v86_v22  ;;  %vm297_vm3 = vnez %v293_v26  ;;  %v300_v28 = vsel %vm296_vm2, 16843009, %v834_v27  ;;  %vm298_vm4 = vnez %v294_v30  ;;  %v100_v22 = vld [vmem:[#allocation7 + $0x8] sm:$0xff]  ;;  %p775_p6 = scmp.ne.s32.totalorder %s576_s3, %s774_s15  ;;  %p780_p8 = scmp.lt.s32.totalorder %s774_s15, %s774_s15 }
  0x3a   :  { %v301_v29 = vsel %vm297_vm3, 16843009, %v834_v27  ;;  %v304_v32 = vunpack.c.0.s8 %v300_v28  ;;  %vm299_vm5 = vnez %v295_v31  ;;  %v302_v34 = vsel %vm298_vm4, 16843009, %v834_v27  ;;  %v101_v28 = vld [vmem:[#allocation7 + $0x10] sm:$0xff] }
  0x3b   :  { %v305_v33 = vunpack.c.0.s8 %v301_v29  ;;  %v303_v35 = vsel %vm299_vm5, 16843009, %v834_v27  ;;  %v306_v43 = vunpack.c.0.s8 %v302_v34  ;;  %v105_v30 = vpack.c.bf16 %v101_v28, %v101_v28  ;;  %p781_p9 = por %p780_p8, %p779_p7 }
  0x3c   :  { %vm308_vm6 = vcmp.ne.s32.totalorder %v304_v32, 0  ;;  %v307_v44 = vunpack.c.0.s8 %v303_v35  ;;  %v102_v32 = vld [vmem:[#allocation7 + $0x18] sm:$0xff] }
  0x3d   :  { %vm309_vm7 = vcmp.ne.s32.totalorder %v305_v33, 0  ;;  %vm310_vm9 = vcmp.ne.s32.totalorder %v306_v43, 0  ;;  %v462_v35 = vsel %vm368_vm11, %v105_v30, 0  ;;  %p782_p10 = pnand %p781_p9, %p775_p6 }
  0x3e   :  { %620 = vmatmul.mubr.msk.bf16.vlgmr.msra.gmra.mxu0 %vm107_vm1, %v87_v15  ;;  %vm311_vm10 = vcmp.ne.s32.totalorder %v307_v44, 0 }
  0x3f   :  { %626 = vmatmul.mubr.msk.bf16.vlgmr.msra.gmra.mxu1 %vm107_vm1, %v88_v16  ;;  %630 = vmatpush3.bf16.xpose.msra.mxu0 %v204_v19  ;;  %v99_v19 = vld [vmem:[#allocation7] sm:$0xff] }
  0x40   :  { %636 = vmatpush3.bf16.xpose.msra.mxu1 %v250_v20  ;;  %631 = vmatprep.mubr.msk.bf16.mxu0 %vm833_vm0, %v832_v0  ;;  %v103_v20 = vpack.c.bf16 %v99_v19, %v99_v19 }
  0x41   :  { %637 = vmatprep.mubr.msk.bf16.mxu1 %vm833_vm0, %v832_v0  ;;  %641 = vmatprep.subr.bf16.mxu0 %v832_v0 }
  0x42   :  { %647 = vmatprep.subr.bf16.mxu1 %v832_v0  ;;  %v370_v21 = vsel %vm368_vm11, %v103_v20, 0 }
  0x46   :  { %632 = vmatmul.mubr.msk.bf16.vlgmr.msra.gmra.mxu0 %vm107_vm1, %v89_v23  ;;  %v104_v23 = vpack.c.bf16 %v100_v22, %v100_v22 }
  0x47   :  { %638 = vmatmul.mubr.msk.bf16.vlgmr.msra.gmra.mxu1 %vm107_vm1, %v90_v24  ;;  %643 = vmatprep.mubr.msk.bf16.mxu0 %vm833_vm0, %v832_v0 }
  0x48   :  { %649 = vmatprep.mubr.msk.bf16.mxu1 %vm833_vm0, %v832_v0  ;;  %642 = vmatpush3.bf16.msra.mxu0 %v370_v21  ;;  %v416_v24 = vsel %vm368_vm11, %v104_v23, 0 }
  0x49   :  { %653 = vmatprep.subr.bf16.mxu0 %v832_v0  ;;  %648 = vmatpush3.bf16.msra.mxu1 %v416_v24 }
  0x4a   :  { %659 = vmatprep.subr.bf16.mxu1 %v832_v0 }
  0xfe   :  { %v148_v36 = vpop.f32.mrf.mxu0 }
  0xff   :  { %v194_v37 = vpop.f32.mrf.mxu1  ;;  %v312_v38 = vsel %vm308_vm6, -1e+09, %v148_v36  ;;  %v106_v36 = vpack.c.bf16 %v102_v32, %v102_v32 }
 0x100   :  { %v313_v39 = vsel %vm309_vm7, -1e+09, %v194_v37  ;;  %v621_v40 = vpop.f32.mrf.mxu0  ;;  %v317_v42 = vsel %vm316_vm8, %v312_v38, -inf }
 0x101   :  { %v627_v41 = vpop.f32.mrf.mxu1  ;;  %318 = vmax.xlane.f32.xlu0 %v317_v42  ;;  %v320_v47 = vsel %vm316_vm8, %v313_v39, -inf  ;;  %v508_v40 = vsel %vm368_vm11, %v106_v36, 0 }
 0x102   :  { %v151_v45 = vpop.f32.mrf.mxu0 }
 0x103   :  { %v197_v46 = vpop.f32.mrf.mxu1 }
 0x104   :  { %v622_v48 = vpop.f32.mrf.mxu0 }
 0x105   :  { %v628_v49 = vpop.f32.mrf.mxu1  ;;  %321 = vmax.xlane.f32.xlu0 %v320_v47 }
 0x106   :  { %v240_v50 = vpop.f32.mrf.mxu0 }
 0x107   :  { %v286_v51 = vpop.f32.mrf.mxu1  ;;  %v314_v52 = vsel %vm310_vm9, -1e+09, %v240_v50 }
 0x108   :  { %v315_v53 = vsel %vm311_vm10, -1e+09, %v286_v51  ;;  %v633_v54 = vpop.f32.mrf.mxu0  ;;  %v323_v56 = vsel %vm316_vm8, %v314_v52, -inf }
 0x109   :  { %v639_v55 = vpop.f32.mrf.mxu1  ;;  %324 = vmax.xlane.f32.xlu1 %v323_v56  ;;  %v326_v59 = vsel %vm316_vm8, %v315_v53, -inf }
 0x10a   :  { %v243_v57 = vpop.f32.mrf.mxu0 }
 0x10b   :  { %v289_v58 = vpop.f32.mrf.mxu1 }
 0x10c   :  { %v634_v60 = vpop.f32.mrf.mxu0 }
 0x10d   :  { %v640_v61 = vpop.f32.mrf.mxu1  ;;  %327 = vmax.xlane.f32.xlu1 %v326_v59 }
 0x18a   :  { %v319_v62 = vpop.xlane.xlu0 %318 }
 0x18b   :  { %v329_v63 = vsub.f32 %v312_v38, %v319_v62 }
 0x18d   :  { %v333_v1 = vmul.f32 1.442695, %v329_v63 }
 0x18e   :  { %v322_v2 = vpop.xlane.xlu0 %321 }
 0x18f   :  { %678 = vpow2.f32 %v333_v1  ;;  %v330_v3 = vsub.f32 %v313_v39, %v322_v2 }
 0x191   :  { %v335_v4 = vmul.f32 1.442695, %v330_v3 }
 0x192   :  { %v325_v5 = vpop.xlane.xlu1 %324 }
 0x193   :  { %680 = vpow2.f32 %v335_v4  ;;  %v331_v6 = vsub.f32 %v314_v52, %v325_v5 }
 0x195   :  { %v337_v7 = vmul.f32 1.442695, %v331_v6 }
 0x196   :  { %v328_v8 = vpop.xlane.xlu1 %327 }
 0x197   :  { %682 = vpow2.f32 %v337_v7  ;;  %v332_v9 = vsub.f32 %v315_v53, %v328_v8 }
 0x199   :  { %v339_v10 = vmul.f32 1.442695, %v332_v9 }
 0x19b   :  { %684 = vpow2.f32 %v339_v10 }
 0x19c   :  { %v679_v11 = vpop.eup %678 }
 0x19d   :  { %v341_v12 = vsel %vm316_vm8, %v679_v11, 0.0 }
 0x19e   :  { %342 = vadd.xlane.f32.xlu0 %v341_v12 }
 0x1a0   :  { %v681_v13 = vpop.eup %680 }
 0x1a1   :  { %v344_v14 = vsel %vm316_vm8, %v681_v13, 0.0 }
 0x1a2   :  { %345 = vadd.xlane.f32.xlu1 %v344_v14 }
 0x1a4   :  { %v683_v15 = vpop.eup %682 }
 0x1a5   :  { %v347_v16 = vsel %vm316_vm8, %v683_v15, 0.0 }
 0x1a6   :  { %348 = vadd.xlane.f32.xlu0 %v347_v16 }
 0x1a8   :  { %v685_v17 = vpop.eup %684 }
 0x1a9   :  { %v350_v18 = vsel %vm316_vm8, %v685_v17, 0.0 }
 0x1aa   :  { %351 = vadd.xlane.f32.xlu1 %v350_v18 }
 0x227   :  { %v343_v25 = vpop.xlane.xlu0 %342 }
 0x228   :  { %686 = vrcp.f32 %v343_v25 }
 0x22b   :  { %v346_v26 = vpop.xlane.xlu1 %345 }
 0x22c   :  { %688 = vrcp.f32 %v346_v26 }
 0x22f   :  { %v349_v27 = vpop.xlane.xlu0 %348 }
 0x230   :  { %690 = vrcp.f32 %v349_v27 }
 0x233   :  { %v352_v29 = vpop.xlane.xlu1 %351 }
 0x234   :  { %692 = vrcp.f32 %v352_v29 }
 0x235   :  { %v687_v31 = vpop.eup %686 }
 0x236   :  { %v357_v33 = vmul.f32 %v687_v31, %v679_v11 }
 0x238   :  { %v361_v34 = vpack.c.bf16 %v357_v33, %v357_v33  ;;  %550 = vst.msk [vmem:[#allocation11] sm:$0xff] %vm316_vm8, %v357_v33 }
 0x239   :  { %v689_v37 = vpop.eup %688 }
 0x23a   :  { %644 = vmatmul.mubr.msk.bf16.vlgmr.msra.gmra.mxu0 %vm316_vm8, %v361_v34  ;;  %v358_v38 = vmul.f32 %v689_v37, %v681_v13 }
 0x23b   :  { %654 = vmatpush3.bf16.msra.mxu0 %v462_v35  ;;  %655 = vmatprep.mubr.msk.bf16.mxu0 %vm833_vm0, %v832_v0 }
 0x23c   :  { %v362_v39 = vpack.c.bf16 %v358_v38, %v358_v38  ;;  %551 = vst.msk [vmem:[#allocation11 + $0x8] sm:$0xff] %vm316_vm8, %v358_v38 }
 0x23d   :  { %v691_v41 = vpop.eup %690 }
 0x23e   :  { %v359_v42 = vmul.f32 %v691_v41, %v683_v15  ;;  %650 = vmatmul.mubr.msk.bf16.vlgmr.msra.gmra.mxu1 %vm316_vm8, %v362_v39 }
 0x23f   :  { %660 = vmatpush3.bf16.msra.mxu1 %v508_v40  ;;  %661 = vmatprep.mubr.msk.bf16.mxu1 %vm833_vm0, %v832_v0 }
 0x240   :  { %552 = vst.msk [vmem:[#allocation11 + $0x10] sm:$0xff] %vm316_vm8, %v359_v42  ;;  %v363_v43 = vpack.c.bf16 %v359_v42, %v359_v42 }
 0x241   :  { %v693_v44 = vpop.eup %692 }
 0x242   :  { %v360_v45 = vmul.f32 %v693_v44, %v685_v17  ;;  %656 = vmatmul.mubr.msk.bf16.vlgmr.msra.gmra.mxu0 %vm316_vm8, %v363_v43 }
 0x244   :  { %553 = vst.msk [vmem:[#allocation11 + $0x18] sm:$0xff] %vm316_vm8, %v360_v45  ;;  %v364_v46 = vpack.c.bf16 %v360_v45, %v360_v45 }
 0x246   :  { %662 = vmatmul.mubr.msk.bf16.vlgmr.msra.gmra.mxu1 %vm316_vm8, %v364_v46 }
 0x247   :  { %785 = shalt.err (!%p782_p10)
}
 0x248   :  { %581 = dma.vmem_to_hbm [thread:$0]  %s576_s3, 512, %s961_s5, [#allocation12], %s826_s23, %s826_s23, %s827_s24  }
 0x249   :  { %s836_s18 = smov [#allocation10]  }
 0x24a   :  { %s563_s19 = sshll.u32 %s836_s18, 4  ;;  %s564_s19 = int_to_ptr.vmem [resolvable:$true] %s563_s19 }
 0x24b   :  { %s794_s5 = scalar_lea.vmem %s564_s19, 512  ;;  %p799_p12 = scmp.lt.s32.totalorder %s564_s19, %s564_s19 }
 0x24c   :  { %p795_p11 = scmp.ne.s32.totalorder %s564_s19, %s794_s5  ;;  %p800_p13 = scmp.lt.s32.totalorder %s794_s5, %s794_s5 }
 0x24e   :  { %p801_p0 = por %p800_p13, %p799_p12 }
 0x250   :  { %p802_p1 = pnand %p801_p0, %p795_p11 }
 0x2fa   :  { %v406_v0 = vpop.f32.mrf.mxu0 }
 0x2fb   :  { %554 = vst.msk [vmem:[#allocation10] sm:$0xff] %vm107_vm1, %v406_v0 }
 0x2fc   :  { %v645_v47 = vpop.f32.mrf.mxu0 }
 0x2fe   :  { %v409_v48 = vpop.f32.mrf.mxu0  ;;  %v452_v49 = vpop.f32.mrf.mxu1 }
 0x2ff   :  { %555 = vst.msk [vmem:[#allocation10 + $0x8] sm:$0xff] %vm107_vm1, %v452_v49 }
 0x300   :  { %v646_v50 = vpop.f32.mrf.mxu0  ;;  %v651_v51 = vpop.f32.mrf.mxu1 }
 0x302   :  { %v455_v52 = vpop.f32.mrf.mxu1  ;;  %v498_v53 = vpop.f32.mrf.mxu0 }
 0x303   :  { %556 = vst.msk [vmem:[#allocation10 + $0x10] sm:$0xff] %vm107_vm1, %v498_v53 }
 0x304   :  { %v652_v54 = vpop.f32.mrf.mxu1  ;;  %v657_v55 = vpop.f32.mrf.mxu0 }
 0x306   :  { %v501_v56 = vpop.f32.mrf.mxu0  ;;  %v544_v57 = vpop.f32.mrf.mxu1 }
 0x307   :  { %557 = vst.msk [vmem:[#allocation10 + $0x18] sm:$0xff] %vm107_vm1, %v544_v57 }
 0x308   :  { %v658_v58 = vpop.f32.mrf.mxu0  ;;  %v663_v59 = vpop.f32.mrf.mxu1 }
 0x309   :  { %805 = shalt.err (!%p802_p1)
}
 0x30a   :  { %569 = dma.vmem_to_hbm [thread:$0]  %s564_s19, 512, %s960_s4, [#allocation4], %s826_s23, %s826_s23, %s827_s24   ;;  %v547_v60 = vpop.f32.mrf.mxu1 }
 0x30c   :  { %v664_v61 = vpop.f32.mrf.mxu1 }
 0x30d   :  { %820 = dma.done.wait [#allocation4], 512  }
 0x30e   :  { %821 = vsyncadd [#allocation4], 4294966784 }
 0x30f   :  { %822 = dma.done.wait [#allocation12], 512  }
 0x310   :  { %823 = vsyncadd [#allocation12], 4294966784 }
 0x311   :  { %588 = vsyncpa [#allocation3], 1 }
 0x312   :  { %589 = vsyncpa [#allocation6], 1 }
 0x313   :  { %590 = vsyncpa [#allocation9], 1 }
 0x314   :  { %591 = vsyncpa [#allocation4], 1 }
 0x315   :  { %592 = vsyncpa [#allocation12], 1 }

</bundles_post_ra>
